<compile_context>
chip_gen: v5e
topology: v5e:2x2
jax: 0.10.0
libtpu: 0.0.40
codegen_flags: <defaults>
</compile_context>

<pallas_src>
import jax
import jax.numpy as jnp
from jax.experimental import pallas as pl
from jax.experimental.pallas import tpu as pltpu


def ensemble_kernel(g_ref, t_ref, w_ref, b_ref, o_ref):
    """Fused: relu( g @ Wp[:D] + t @ Wp[D:] + b ).

    g_ref : (TM, D)    bf16 gnn embedding tile
    t_ref : (TM, D)    bf16 transformer embedding tile
    w_ref : (2D, TN)   bf16 packed projection weight (N-tile), VMEM-resident
    b_ref : (1, TN)    f32 bias row
    o_ref : (TM, TN)   f32 output tile
    """
    d = g_ref.shape[-1]
    # Two full-depth (K = D) MXU pushes into one f32 accumulator; the weight
    # halves are static slices of the single resident packed weight tile.
    acc = jnp.dot(g_ref[...], w_ref[:d, :], preferred_element_type=jnp.float32)
    acc = acc + jnp.dot(t_ref[...], w_ref[d:, :],
                        preferred_element_type=jnp.float32)
    acc = acc + b_ref[...]                     # f32 bias broadcast over rows
    o_ref[...] = jnp.maximum(acc, 0.0).astype(o_ref.dtype)


def pack_reduce_proj_params(weight, bias, param_dtype=jnp.bfloat16):
    """One-time, at parameter-load time (NOT per forward call).

    weight: (D, 2D) torch nn.Linear weight;  bias: (D,).
    Returns w_packed (2D, D) with rows 0:D = W[:, :D].T (gnn half) and rows
    D:2D = W[:, D:].T (transformer half), plus a (1, D) f32 bias row.
    """
    D = weight.shape[0]
    w_packed = weight.T.astype(param_dtype)          # (2D, D)
    bias_row = bias.reshape(1, D).astype(jnp.float32)
    return w_packed, bias_row


def ensemble_reduce_proj(g_emb, t_emb, w_packed, bias_row, *, tm=128, tn=256):
    """g_emb, t_emb: (B, D) bf16;  w_packed: (2D, D) bf16;  bias_row: (1, D) f32."""
    B, D = g_emb.shape
    assert w_packed.shape == (2 * D, D)
    tm = min(tm, B)
    tn = min(tn, D)
    assert B % tm == 0 and D % tn == 0
    assert tm % 8 == 0 and tn % 128 == 0, "tiles must be (8,128)-aligned"

    grid = (B // tm, D // tn)

    cost = pl.CostEstimate(
        flops=2 * B * (2 * D) * D,
        transcendentals=0,
        bytes_accessed=(g_emb.size * g_emb.dtype.itemsize
                        + t_emb.size * t_emb.dtype.itemsize
                        + w_packed.size * w_packed.dtype.itemsize
                        + bias_row.size * 4
                        + B * D * 4),
    )

    return pl.pallas_call(
        ensemble_kernel,
        out_shape=jax.ShapeDtypeStruct((B, D), jnp.float32),
        grid_spec=pltpu.PrefetchScalarGridSpec(
            num_scalar_prefetch=0,
            grid=grid,
            in_specs=[
                pl.BlockSpec((tm, D), lambda i, j: (i, 0)),       # g tile
                pl.BlockSpec((tm, D), lambda i, j: (i, 0)),       # t tile
                pl.BlockSpec((2 * D, tn), lambda i, j: (0, j)),   # weight (resident over i)
                pl.BlockSpec((1, tn), lambda i, j: (0, j)),       # bias
            ],
            out_specs=pl.BlockSpec((tm, tn), lambda i, j: (i, j)),
        ),
        compiler_params=pltpu.CompilerParams(
            dimension_semantics=("parallel", "parallel"),
            vmem_limit_bytes=32 * 1024 * 1024,
        ),
        cost_estimate=cost,
    )(g_emb, t_emb, w_packed, bias_row)


def reference(g_emb, t_emb, w_packed, bias_row):
    """Pure-JAX reference on the same bf16-rounded values (f32 math)."""
    x = jnp.concatenate([g_emb.astype(jnp.float32),
                         t_emb.astype(jnp.float32)], axis=1)
    return jnp.maximum(x @ w_packed.astype(jnp.float32) + bias_row, 0.0)


if __name__ == "__main__":
    key = jax.random.PRNGKey(0)
    # Lane-dense model dim (multiple of 128) and enough batch rows to tile.
    B, D_IN, D_MODEL = 256, 64, 256

    k_x0, k_x1, k_g, k_t, k_w, k_b = jax.random.split(key, 6)

    # Raw inputs to the two sub-models (data[0], data[1]).
    x_gnn = jax.random.normal(k_x0, (B, D_IN), jnp.float32)
    x_tfm = jax.random.normal(k_x1, (B, D_IN), jnp.float32)

    # TODO(synk): gnn_model / transformer_model are external black-box modules
    # in the PyTorch code; stood in here by deterministic linear maps
    # D_IN -> D_MODEL.  (If they really ended in linear layers they could be
    # algebraically folded into the reduce_proj weight; not done since the
    # module treats them as opaque.)
    Wg = jax.random.normal(k_g, (D_IN, D_MODEL), jnp.float32) / jnp.sqrt(D_IN)
    Wt = jax.random.normal(k_t, (D_IN, D_MODEL), jnp.float32) / jnp.sqrt(D_IN)
    g_emb = (x_gnn @ Wg).astype(jnp.bfloat16)      # (B, D_MODEL) bf16 activations
    t_emb = (x_tfm @ Wt).astype(jnp.bfloat16)      # (B, D_MODEL)

    # nn.Linear(2*d_model, d_model) parameters, torch default uniform init.
    bound = 1.0 / jnp.sqrt(jnp.float32(2 * D_MODEL))
    weight = jax.random.uniform(k_w, (D_MODEL, 2 * D_MODEL), jnp.float32,
                                minval=-bound, maxval=bound)
    bias = jax.random.uniform(k_b, (D_MODEL,), jnp.float32,
                              minval=-bound, maxval=bound)

    # One-time parameter packing (hoisted out of the forward path).
    w_packed, bias_row = pack_reduce_proj_params(weight, bias)

    out = ensemble_reduce_proj(g_emb, t_emb, w_packed, bias_row)
    out = jax.block_until_ready(out)

    ref = reference(g_emb, t_emb, w_packed, bias_row)
    assert out.shape == (B, D_MODEL)
    assert out.dtype == jnp.float32
    assert jnp.allclose(out, ref, atol=2e-3, rtol=2e-3)
    print("KERNEL_OK")
</pallas_src>

<mosaic_0001>
module attributes {stable_mosaic.version = 11 : i64} {
  func.func @ensemble_kernel(%arg0: i32, %arg1: i32, %arg2: memref<128x256xbf16, #tpu.memory_space<vmem>>, %arg3: memref<128x256xbf16, #tpu.memory_space<vmem>>, %arg4: memref<512x256xbf16, #tpu.memory_space<vmem>>, %arg5: memref<1x256xf32, #tpu.memory_space<vmem>>, %arg6: memref<128x256xf32, #tpu.memory_space<vmem>>) attributes {dimension_semantics = [#tpu.dimension_semantics<parallel>, #tpu.dimension_semantics<parallel>], iteration_bounds = array<i64: 2, 1>, scalar_prefetch = 0 : i64, scratch_operands = 0 : i64, tpu.core_type = #tpu.core_type<tc>, window_params = [{transform_indices = @transform_0, window_bounds = array<i64: 128, 256>}, {transform_indices = @transform_1, window_bounds = array<i64: 128, 256>}, {transform_indices = @transform_2, window_bounds = array<i64: 512, 256>}, {transform_indices = @transform_3, window_bounds = array<i64: 1, 256>}, {transform_indices = @transform_4, window_bounds = array<i64: 128, 256>}]} {
    %c0 = arith.constant 0 : index
    %c0_0 = arith.constant 0 : index
    %0 = vector.load %arg2[%c0, %c0_0] : memref<128x256xbf16, #tpu.memory_space<vmem>>, vector<128x256xbf16>
    %c0_1 = arith.constant 0 : index
    %c0_2 = arith.constant 0 : index
    %1 = vector.load %arg4[%c0_1, %c0_2] : memref<512x256xbf16, #tpu.memory_space<vmem>>, vector<256x256xbf16>
    %cst = arith.constant dense<0.000000e+00> : vector<128x256xf32>
    %2 = tpu.matmul %0, %1, %cst {dimension_numbers = #tpu.dot_dimension_numbers<[1], [0], [0], [1], [0, 0, 1, 1], [], []>} : vector<128x256xbf16>, vector<256x256xbf16>, vector<128x256xf32> -> vector<128x256xf32>
    %c0_3 = arith.constant 0 : index
    %c0_4 = arith.constant 0 : index
    %3 = vector.load %arg3[%c0_3, %c0_4] : memref<128x256xbf16, #tpu.memory_space<vmem>>, vector<128x256xbf16>
    %c256 = arith.constant 256 : index
    %c0_5 = arith.constant 0 : index
    %4 = vector.load %arg4[%c256, %c0_5] : memref<512x256xbf16, #tpu.memory_space<vmem>>, vector<256x256xbf16>
    %cst_6 = arith.constant dense<0.000000e+00> : vector<128x256xf32>
    %5 = tpu.matmul %3, %4, %cst_6 {dimension_numbers = #tpu.dot_dimension_numbers<[1], [0], [0], [1], [0, 0, 1, 1], [], []>} : vector<128x256xbf16>, vector<256x256xbf16>, vector<128x256xf32> -> vector<128x256xf32>
    %6 = arith.addf %2, %5 : vector<128x256xf32>
    %c0_7 = arith.constant 0 : index
    %c0_8 = arith.constant 0 : index
    %7 = vector.load %arg5[%c0_7, %c0_8] : memref<1x256xf32, #tpu.memory_space<vmem>>, vector<1x256xf32>
    %8 = vector.broadcast %7 : vector<1x256xf32> to vector<128x256xf32>
    %9 = arith.addf %6, %8 : vector<128x256xf32>
    %cst_9 = arith.constant 0.000000e+00 : f32
    %10 = vector.broadcast %cst_9 : f32 to vector<128x256xf32>
    %11 = arith.maximumf %9, %10 : vector<128x256xf32>
    %c0_10 = arith.constant 0 : index
    %c0_11 = arith.constant 0 : index
    %12 = vector.load %arg6[%c0_10, %c0_11] : memref<128x256xf32, #tpu.memory_space<vmem>>, vector<128x256xf32>
    tpu.vector_store %arg6[%c0_10, %c0_11], %11 {strides = array<i32>} : memref<128x256xf32, #tpu.memory_space<vmem>>, vector<128x256xf32>,
    return
  }
  func.func @transform_0(%arg0: i32, %arg1: i32) -> (i32, i32) {
    %c0_i32 = arith.constant 0 : i32
    %c0_i32_0 = arith.constant 0 : i32
    return %arg0, %c0_i32 : i32, i32
  }
  func.func @transform_1(%arg0: i32, %arg1: i32) -> (i32, i32) {
    %c0_i32 = arith.constant 0 : i32
    %c0_i32_0 = arith.constant 0 : i32
    return %arg0, %c0_i32 : i32, i32
  }
  func.func @transform_2(%arg0: i32, %arg1: i32) -> (i32, i32) {
    %c0_i32 = arith.constant 0 : i32
    %c0_i32_0 = arith.constant 0 : i32
    return %c0_i32, %arg1 : i32, i32
  }
  func.func @transform_3(%arg0: i32, %arg1: i32) -> (i32, i32) {
    %c0_i32 = arith.constant 0 : i32
    %c0_i32_0 = arith.constant 0 : i32
    return %c0_i32, %arg1 : i32, i32
  }
  func.func @transform_4(%arg0: i32, %arg1: i32) -> (i32, i32) {
    %c0_i32 = arith.constant 0 : i32
    return %arg0, %arg1 : i32, i32
  }
}

</mosaic_0001>

<bundles_post_ra>
// kernel: tpu_custom_call.1
= control target key start
LH: loop header
LB: loop body
LE: loop exit
PB: predicated region body
PF: predicated region fallthrough
CT: control target
= control target key end

     0   :  { %s2750_s0 = inlined_call_operand.hbm [shape: bf16[256,256], index: 0, kind: input, shape index: {}]   ;;  %s2751_s1 = inlined_call_operand.hbm [shape: bf16[256,256], index: 1, kind: input, shape index: {}]   ;;  %s2752_s2 = inlined_call_operand.hbm [shape: bf16[512,256], index: 2, kind: input, shape index: {}]   ;;  %s2753_s3 = inlined_call_operand.vmem [shape: f32[1,256], index: 3, kind: input, shape index: {}]   ;;  %s2754_s4 = inlined_call_operand.hbm [shape: f32[256,256], index: 4, kind: output, shape index: {}]  }
   0x1   :  { %2761 = sst [smem:[#allocation16_spill]] %s2752_s2 }
   0x2   :  { %9 = vsyncpa [#allocation3], 0 }
   0x3   :  { %11 = vsyncpa [#allocation3 + $0x1], 0 }
   0x4   :  { %12 = vsyncpa [#allocation6], 0 }
   0x5   :  { %14 = vsyncpa [#allocation6 + $0x1], 0 }
   0x6   :  { %15 = vsyncpa [#allocation4], 0 }
   0x7   :  { %17 = vsyncpa [#allocation4 + $0x1], 0  ;;  %s2348_s15 = smov 0   ;;  %s2350_s16 = smov 0  }
   0x8   :  { %s2352_s17 = smov 0   ;;  %s2354_s18 = smov 0  }
   0x9   :  { %s2356_s19 = smov 0   ;;  %s2358_s20 = smov 0  }
   0xa LB: > { %2762 = sst [smem:[#allocation13_spill]] %s2312_s19  ;;  %s2379_s21 = sadd.s32 4294967295, %s2316_s20   ;;  %s2316_s20 = sphi %s2358_s20, %s23_s20   ;;  %s2312_s19 = sphi %s2356_s19, %s2775_s19   ;;  %s2308_s18 = sphi %s2354_s18, %s2774_s18   ;;  %s2304_s17 = sphi %s2352_s17, %s2778_s17   ;;  %s2300_s16 = sphi %s2350_s16, %s2777_s16   ;;  %s2296_s15 = sphi %s2348_s15, %s2776_s15  }
   0xb   : > { %s1544_s22 = sadd.s32 4294967294, %s2316_s20   ;;  %p55_p0 = scmp.ne.s32.totalorder %s2300_s16, %s2296_s15 }
   0xc   : > { %p56_p1 = scmp.eq.s32.totalorder %s2379_s21, 0  ;;  %p159_p2 = scmp.eq.s32.totalorder %s2379_s21, 1 }
   0xd   : > { %p165_p3 = scmp.eq.s32.totalorder %s1544_s22, 1  ;;  %p1545_p5 = scmp.ge.s32.totalorder %s2316_s20, 1 }
   0xe   : > { %p2388_p4 = por %p56_p1, %p55_p0  ;;  %p172_p7 = scmp.lt.s32.totalorder %s2316_s20, 3 }
   0xf   : > { %p2393_p6 = por %p165_p3, %p55_p0  ;;  %s2765_s2 = sld [smem:[#allocation16_spill]] }
  0x10   : > { %p2401_p8 = pnand %p1545_p5, %p172_p7  ;;  %s2318_s29 = smov [#allocation7]  }
  0x11   : > { %s188_s30 = sshll.u32 %s2318_s29, 4  ;;  %p1548_p11 = scmp.ge.s32.totalorder %s2316_s20, 2  ;;  %s189_s30 = int_to_ptr.vmem [resolvable:$true] %s188_s30 }
  0x12   : > { %p2064_p9 = pneg %p2401_p8  ;;  %s2755_s5 = smov 128  }
  0x13   : > { %s2757_s6 = smov 8   ;;  %s35_s7 = sadd.s32 1, %s2312_s19 }
  0x14   : > { %p2065_p10 = pnand %p2064_p9, %p56_p1  ;;  %p37_p12 = scmp.ge.s32.totalorder %s35_s7, 2 }
  0x15   : > { %s186_s27 = sshll.u32 %s2765_s2, 4  ;;  %s42_s8 = sadd.s32 1, %s2304_s17  ;;  %s187_s27 = int_to_ptr.hbm [resolvable:$true] %s186_s27 }
  0x16   : > { %2067 = dma.hbm_to_vmem [thread:$0]  (!%p2065_p10), %s187_s27, 8192, %s189_s30, [#allocation6], %s2755_s5, %s2755_s5, %s2757_s6  }
  0x17   : > { %p49_p13 = scmp.ne.s32.totalorder %s2304_s17, %s2300_s16  ;;  %p50_p0 = scmp.eq.s32.totalorder %s2316_s20, 0 }
  0x18   : > { %s2780_s7 = smov (%p37_p12, %s35_s7), 0  ;;  %p2080_p7 = scmp.lt.s32.totalorder %s2316_s20, 2 }
  0x19   : > { %2767 = sst [smem:[#allocation14_spill]] %s2780_s7  ;;  %p2420_p3 = por %p50_p0, %p49_p13 }
  0x1a   : > { %p2426_p5 = por %p159_p2, %p49_p13  ;;  %s39_s11 = ssub.s32 %s2312_s19, %s2780_s7 }
  0x1b   : > { %p40_p9 = scmp.eq.s32.totalorder %s39_s11, 0  ;;  %s210_s12 = sand.u32 1, %s2304_s17  }
  0x1c   : > { %s1549_s13 = sshll.u32 %s210_s12, 7  ;;  %s1953_s22 = sshll.u32 %s2312_s19, 7 }
  0x1d   : > { %s2435_s14 = scalar_select %p40_p9, %s2304_s17, %s42_s8  }
  0x1e   : > { %s220_s27 = scalar_lea.hbm %s2750_s0, %s1953_s22  ;;  %s214_s29 = scalar_lea.vmem [#allocation2], %s1549_s13 }
  0x1f   : > { %2770 = sst [smem:[#allocation15_spill]] %s2435_s14  ;;  %s223_s30 = sshll.u32 %s214_s29, 4  ;;  %s224_s30 = int_to_ptr.vmem [resolvable:$true] %s223_s30 }
  0x20   : > { %s221_s5 = sshll.u32 %s220_s27, 4  ;;  %p2069_p2 = pnand %p2080_p7, %p2420_p3  ;;  %s222_s5 = int_to_ptr.hbm [resolvable:$true] %s221_s5 }
  0x21   : > { %s243_s11 = scalar_lea.hbm %s2751_s1, %s1953_s22  ;;  %s211_s8 = scalar_lea.sflag [#allocation3], %s210_s12 }
  0x22   : > { %s244_s7 = sshll.u32 %s243_s11, 4  ;;  %s2771_s14 = smov 8   ;;  %s245_s7 = int_to_ptr.hbm [resolvable:$true] %s244_s7 }
  0x23   : > { %s2772_s19 = smov 128   ;;  %s237_s25 = scalar_lea.vmem [#allocation5], %s1549_s13 }
  0x24   : > { %2071 = dma.hbm_to_vmem [thread:$0]  (!%p2069_p2), %s222_s5, 2048, %s224_s30, %s211_s8, %s2772_s19, %s2772_s19, %s2771_s14  }
  0x25   : > { %s246_s26 = sshll.u32 %s237_s25, 4  ;;  %s233_s29 = sand.u32 1, %s2316_s20   ;;  %s247_s26 = int_to_ptr.vmem [resolvable:$true] %s246_s26 }
  0x26   : > { %s234_s27 = scalar_lea.sflag [#allocation6], %s233_s29  ;;  %258 = sbr.rel (%p2401_p8) target bundleno = 477 (0x1dd), region = 36 }
  0x27   : > { %2074 = dma.hbm_to_vmem [thread:$0]  (!%p2069_p2), %s245_s7, 2048, %s247_s26, %s234_s27, %s2772_s19, %s2772_s19, %s2771_s14  }
  0x28   : > { %s2456_s2 = sand.u32 (!%p2401_p8), 1, %s2300_s16  }
  0x29   : > { %s1558_s5 = sshll.u32 (!%p2401_p8), %s2456_s2, 7  ;;  %s261_s6 = scalar_lea.sflag (!%p2401_p8), [#allocation3], %s2456_s2 }
  0x2a   : > { %s2460_s9 = scalar_lea.vmem (!%p2401_p8), [#allocation2], %s1558_s5 }
  0x2b   : > { %2279 = dma.done.wait (%p2388_p4), %s261_s6, 2048  }
  0x2c   : > { %2281 = vsyncadd (%p2388_p4), %s261_s6, 4294965248  ;;  %s270_s19 = sand.u32 1, %s2379_s21   ;;  %s2467_s7 = scalar_lea.vmem [#allocation5], %s1558_s5 }
  0x2d   : > { %s271_s28 = scalar_lea.sflag [#allocation6], %s270_s19 }
  0x2e   : > { %2283 = dma.done.wait (%p2388_p4), %s271_s28, 2048  }
  0x2f   : > { %2285 = vsyncadd (%p2388_p4), %s271_s28, 4294965248 }
  0x30   : > { %2287 = dma.done.wait (%p56_p1), [#allocation6], 8192  }
  0x31   : > { %2289 = vsyncadd (%p56_p1), [#allocation6], 4294959104  ;;  %v1684_v0 = vld [vmem:[#allocation7 + $0x170] sm:$0xf]  ;;  %v2035_v1 = vld [vmem:[#allocation7 + $0x174] sm:$0xf0] }
  0x32   : > { %v1748_v2 = vld [vmem:[#allocation7 + $0x1f0] sm:$0xf]  ;;  %v1685_v3 = vor.u32 %v2035_v1, %v1684_v0  ;;  %v2051_v4 = vld [vmem:[#allocation7 + $0x1f4] sm:$0xf0]  ;;  %v2034_v5 = vld [vmem:[#allocation7 + $0x174] sm:$0xf] }
  0x33   : > { %v1686_v6 = vld [vmem:[#allocation7 + $0x178] sm:$0xf0]  ;;  %v1749_v7 = vor.u32 %v2051_v4, %v1748_v2  ;;  %v2050_v9 = vld [vmem:[#allocation7 + $0x1f4] sm:$0xf]  ;;  %v1676_v11 = vld [vmem:[#allocation7 + $0x160] sm:$0xf] }
  0x34   : > { %v1689_v8 = vor.u32 %v2034_v5, %v1686_v6  ;;  %v1750_v10 = vld [vmem:[#allocation7 + $0x1f8] sm:$0xf0]  ;;  %660 = vmatpush.bf16.msra.mxu0 %v1685_v3  ;;  %v2033_v13 = vld [vmem:[#allocation7 + $0x164] sm:$0xf0]  ;;  %v1740_v14 = vld [vmem:[#allocation7 + $0x1e0] sm:$0xf] }
  0x35   : > { %v1753_v12 = vor.u32 %v2050_v9, %v1750_v10  ;;  %v2049_v15 = vld [vmem:[#allocation7 + $0x1e4] sm:$0xf0]  ;;  %709 = vmatpush.bf16.msra.mxu1 %v1749_v7  ;;  %v1677_v16 = vor.u32 %v2033_v13, %v1676_v11  ;;  %v2032_v18 = vld [vmem:[#allocation7 + $0x164] sm:$0xf]  ;;  %v1678_v19 = vld [vmem:[#allocation7 + $0x168] sm:$0xf0] }
  0x36   : > { %758 = vmatpush.bf16.msra.mxu2 %v1689_v8  ;;  %v1741_v17 = vor.u32 %v2049_v15, %v1740_v14  ;;  %v2048_v20 = vld [vmem:[#allocation7 + $0x1e4] sm:$0xf]  ;;  %v1681_v21 = vor.u32 %v2032_v18, %v1678_v19  ;;  %v1742_v22 = vld [vmem:[#allocation7 + $0x1e8] sm:$0xf0]  ;;  %v1668_v23 = vld [vmem:[#allocation7 + $0x150] sm:$0xf] }
  0x37   : > { %807 = vmatpush.bf16.msra.mxu3 %v1753_v12  ;;  %v2031_v24 = vld [vmem:[#allocation7 + $0x154] sm:$0xf0]  ;;  %v1745_v25 = vor.u32 %v2048_v20, %v1742_v22  ;;  %v1732_v26 = vld [vmem:[#allocation7 + $0x1d0] sm:$0xf]  ;;  %v2030_v28 = vld [vmem:[#allocation7 + $0x154] sm:$0xf] }
  0x38   : > { %v2047_v27 = vld [vmem:[#allocation7 + $0x1d4] sm:$0xf0]  ;;  %661 = vmatpush.bf16.msra.mxu0 %v1677_v16  ;;  %v1669_v29 = vor.u32 %v2031_v24, %v1668_v23  ;;  %v1670_v30 = vld [vmem:[#allocation7 + $0x158] sm:$0xf0]  ;;  %v2046_v31 = vld [vmem:[#allocation7 + $0x1d4] sm:$0xf] }
  0x39   : > { %v1734_v32 = vld [vmem:[#allocation7 + $0x1d8] sm:$0xf0]  ;;  %710 = vmatpush.bf16.msra.mxu1 %v1741_v17  ;;  %v1733_v33 = vor.u32 %v2047_v27, %v1732_v26  ;;  %v1673_v34 = vor.u32 %v2030_v28, %v1670_v30  ;;  %v1660_v35 = vld [vmem:[#allocation7 + $0x140] sm:$0xf]  ;;  %v2029_v36 = vld [vmem:[#allocation7 + $0x144] sm:$0xf0] }
  0x3a   : > { %759 = vmatpush.bf16.msra.mxu2 %v1681_v21  ;;  %v1724_v37 = vld [vmem:[#allocation7 + $0x1c0] sm:$0xf]  ;;  %v1737_v38 = vor.u32 %v2046_v31, %v1734_v32  ;;  %v2045_v39 = vld [vmem:[#allocation7 + $0x1c4] sm:$0xf0]  ;;  %v2028_v40 = vld [vmem:[#allocation7 + $0x144] sm:$0xf]  ;;  %v1661_v44 = vor.u32 %v2029_v36, %v1660_v35 }
  0x3b   : > { %808 = vmatpush.bf16.msra.mxu3 %v1745_v25  ;;  %v1662_v41 = vld [vmem:[#allocation7 + $0x148] sm:$0xf0]  ;;  %v2044_v42 = vld [vmem:[#allocation7 + $0x1c4] sm:$0xf]  ;;  %v1725_v45 = vor.u32 %v2045_v39, %v1724_v37  ;;  %v1652_v47 = vld [vmem:[#allocation7 + $0x130] sm:$0xf] }
  0x3c   : > { %v1726_v43 = vld [vmem:[#allocation7 + $0x1c8] sm:$0xf0]  ;;  %662 = vmatpush.bf16.msra.mxu0 %v1669_v29  ;;  %v1665_v46 = vor.u32 %v2028_v40, %v1662_v41  ;;  %v2027_v48 = vld [vmem:[#allocation7 + $0x134] sm:$0xf0]  ;;  %v1716_v49 = vld [vmem:[#allocation7 + $0x1b0] sm:$0xf] }
  0x3d   : > { %711 = vmatpush.bf16.msra.mxu1 %v1733_v33  ;;  %v1729_v50 = vor.u32 %v2044_v42, %v1726_v43  ;;  %v2043_v51 = vld [vmem:[#allocation7 + $0x1b4] sm:$0xf0]  ;;  %v2026_v52 = vld [vmem:[#allocation7 + $0x134] sm:$0xf]  ;;  %v1654_v53 = vld [vmem:[#allocation7 + $0x138] sm:$0xf0]  ;;  %v1653_v56 = vor.u32 %v2027_v48, %v1652_v47 }
  0x3e   : > { %760 = vmatpush.bf16.msra.mxu2 %v1673_v34  ;;  %v2042_v54 = vld [vmem:[#allocation7 + $0x1b4] sm:$0xf]  ;;  %v1718_v55 = vld [vmem:[#allocation7 + $0x1b8] sm:$0xf0]  ;;  %v1717_v57 = vor.u32 %v2043_v51, %v1716_v49  ;;  %v1657_v58 = vor.u32 %v2026_v52, %v1654_v53  ;;  %v1644_v59 = vld [vmem:[#allocation7 + $0x120] sm:$0xf] }
  0x3f   : > { %809 = vmatpush.bf16.msra.mxu3 %v1737_v38  ;;  %v2025_v60 = vld [vmem:[#allocation7 + $0x124] sm:$0xf0]  ;;  %v1708_v61 = vld [vmem:[#allocation7 + $0x1a0] sm:$0xf]  ;;  %v1721_v62 = vor.u32 %v2042_v54, %v1718_v55  ;;  %v2024_v0 = vld [vmem:[#allocation7 + $0x124] sm:$0xf] }
  0x40   : > { %663 = vmatpush.bf16.msra.mxu0 %v1661_v44  ;;  %v2041_v63 = vld [vmem:[#allocation7 + $0x1a4] sm:$0xf0]  ;;  %v1646_v1 = vld [vmem:[#allocation7 + $0x128] sm:$0xf0]  ;;  %v2040_v2 = vld [vmem:[#allocation7 + $0x1a4] sm:$0xf]  ;;  %v1645_v4 = vor.u32 %v2025_v60, %v1644_v59 }
  0x41   : > { %712 = vmatpush.bf16.msra.mxu1 %v1725_v45  ;;  %v1710_v3 = vld [vmem:[#allocation7 + $0x1a8] sm:$0xf0]  ;;  %v1709_v5 = vor.u32 %v2041_v63, %v1708_v61  ;;  %v1649_v6 = vor.u32 %v2024_v0, %v1646_v1  ;;  %v1636_v7 = vld [vmem:[#allocation7 + $0x110] sm:$0xf]  ;;  %v2023_v8 = vld [vmem:[#allocation7 + $0x114] sm:$0xf0] }
  0x42   : > { %761 = vmatpush.bf16.msra.mxu2 %v1665_v46  ;;  %v1700_v9 = vld [vmem:[#allocation7 + $0x190] sm:$0xf]  ;;  %v1713_v10 = vor.u32 %v2040_v2, %v1710_v3  ;;  %v2039_v11 = vld [vmem:[#allocation7 + $0x194] sm:$0xf0]  ;;  %v2022_v12 = vld [vmem:[#allocation7 + $0x114] sm:$0xf]  ;;  %v1637_v16 = vor.u32 %v2023_v8, %v1636_v7 }
  0x43   : > { %810 = vmatpush.bf16.msra.mxu3 %v1729_v50  ;;  %v1638_v13 = vld [vmem:[#allocation7 + $0x118] sm:$0xf0]  ;;  %v2038_v14 = vld [vmem:[#allocation7 + $0x194] sm:$0xf]  ;;  %v1628_v17 = vld [vmem:[#allocation7 + $0x100] sm:$0xf]  ;;  %v1701_v19 = vor.u32 %v2039_v11, %v1700_v9 }
  0x44   : > { %664 = vmatpush.bf16.msra.mxu0 %v1653_v56  ;;  %v1702_v15 = vld [vmem:[#allocation7 + $0x198] sm:$0xf0]  ;;  %v2021_v18 = vld [vmem:[#allocation7 + $0x104] sm:$0xf0]  ;;  %v1641_v20 = vor.u32 %v2022_v12, %v1638_v13  ;;  %v1692_v21 = vld [vmem:[#allocation7 + $0x180] sm:$0xf] }
  0x45   : > { %713 = vmatpush.bf16.msra.mxu1 %v1717_v57  ;;  %v2037_v22 = vld [vmem:[#allocation7 + $0x184] sm:$0xf0]  ;;  %v2020_v23 = vld [vmem:[#allocation7 + $0x104] sm:$0xf]  ;;  %v1705_v24 = vor.u32 %v2038_v14, %v1702_v15  ;;  %v1630_v25 = vld [vmem:[#allocation7 + $0x108] sm:$0xf0]  ;;  %v1629_v31 = vor.u32 %v2021_v18, %v1628_v17 }
  0x46   : > { %762 = vmatpush.bf16.msra.mxu2 %v1657_v58  ;;  %v2036_v26 = vld [vmem:[#allocation7 + $0x184] sm:$0xf]  ;;  %v1694_v27 = vld [vmem:[#allocation7 + $0x188] sm:$0xf0]  ;;  %v1564_v28 = vld [vmem:[%s2467_s7] sm:$0xf]  ;;  %v1693_v35 = vor.u32 %v2037_v22, %v1692_v21  ;;  %v1633_v36 = vor.u32 %v2020_v23, %v1630_v25 }
  0x47   : > { %811 = vmatpush.bf16.msra.mxu3 %v1721_v62  ;;  %v1986_v29 = vld [vmem:[#allocation7 + $0x74] sm:$0xf]  ;;  %v1878_v30 = vld [vmem:[#allocation7 + $0x78] sm:$0xf0]  ;;  %v2005_v32 = vld [vmem:[%s2467_s7 + $0x4] sm:$0xf0]  ;;  %v1697_v39 = vor.u32 %v2036_v26, %v1694_v27 }
  0x48   : > { %665 = vmatpush.bf16.msra.mxu0 %v1645_v4  ;;  %v2002_v33 = vld [vmem:[#allocation7 + $0xf4] sm:$0xf]  ;;  %v1942_v34 = vld [vmem:[#allocation7 + $0xf8] sm:$0xf0]  ;;  %v2004_v37 = vld [vmem:[%s2467_s7 + $0x4] sm:$0xf]  ;;  %v1881_v40 = vor.u32 %v1986_v29, %v1878_v30  ;;  %v1565_v44 = vor.u32 %v2005_v32, %v1564_v28 }
  0x49   : > { %714 = vmatpush.bf16.msra.mxu1 %v1709_v5  ;;  %v1566_v38 = vld [vmem:[%s2467_s7 + $0x8] sm:$0xf0]  ;;  %v1876_v41 = vld [vmem:[#allocation7 + $0x70] sm:$0xf]  ;;  %v1987_v42 = vld [vmem:[#allocation7 + $0x74] sm:$0xf0]  ;;  %v1945_v45 = vor.u32 %v2002_v33, %v1942_v34 }
  0x4a   : > { %763 = vmatpush.bf16.msra.mxu2 %v1649_v6  ;;  %v1940_v43 = vld [vmem:[#allocation7 + $0xf0] sm:$0xf]  ;;  %v2003_v46 = vld [vmem:[#allocation7 + $0xf4] sm:$0xf0]  ;;  %v1984_v47 = vld [vmem:[#allocation7 + $0x64] sm:$0xf]  ;;  %v1569_v49 = vor.u32 %v2004_v37, %v1566_v38  ;;  %v1877_v52 = vor.u32 %v1987_v42, %v1876_v41 }
  0x4b   : > { %812 = vmatpush.bf16.msra.mxu3 %v1713_v10  ;;  %v1870_v48 = vld [vmem:[#allocation7 + $0x68] sm:$0xf0]  ;;  %v2000_v50 = vld [vmem:[#allocation7 + $0xe4] sm:$0xf]  ;;  %v1941_v53 = vor.u32 %v2003_v46, %v1940_v43  ;;  %v1868_v55 = vld [vmem:[#allocation7 + $0x60] sm:$0xf] }
  0x4c   : > { %666 = vmatpush.bf16.msra.mxu0 %v1637_v16  ;;  %v1934_v51 = vld [vmem:[#allocation7 + $0xe8] sm:$0xf0]  ;;  %v1873_v54 = vor.u32 %v1984_v47, %v1870_v48  ;;  %v1985_v56 = vld [vmem:[#allocation7 + $0x64] sm:$0xf0]  ;;  %v1932_v58 = vld [vmem:[#allocation7 + $0xe0] sm:$0xf] }
  0x4d   : > { %715 = vmatpush.bf16.msra.mxu1 %v1701_v19  ;;  %v1937_v57 = vor.u32 %v2000_v50, %v1934_v51  ;;  %v2001_v59 = vld [vmem:[#allocation7 + $0xe4] sm:$0xf0]  ;;  %v1869_v60 = vor.u32 %v1985_v56, %v1868_v55  ;;  %v1982_v61 = vld [vmem:[#allocation7 + $0x54] sm:$0xf]  ;;  %v1862_v62 = vld [vmem:[#allocation7 + $0x58] sm:$0xf0] }
  0x4e   : > { %764 = vmatpush.bf16.msra.mxu2 %v1641_v20  ;;  %v1998_v63 = vld [vmem:[#allocation7 + $0xd4] sm:$0xf]  ;;  %v1933_v0 = vor.u32 %v2001_v59, %v1932_v58  ;;  %v1865_v1 = vor.u32 %v1982_v61, %v1862_v62  ;;  %v1926_v2 = vld [vmem:[#allocation7 + $0xd8] sm:$0xf0]  ;;  %v1860_v3 = vld [vmem:[#allocation7 + $0x50] sm:$0xf] }
  0x4f   : > { %813 = vmatpush.bf16.msra.mxu3 %v1705_v24  ;;  %v1983_v4 = vld [vmem:[#allocation7 + $0x54] sm:$0xf0]  ;;  %v1929_v5 = vor.u32 %v1998_v63, %v1926_v2  ;;  %v1924_v6 = vld [vmem:[#allocation7 + $0xd0] sm:$0xf]  ;;  %v2006_v12 = vld [vmem:[%s2467_s7 + $0x14] sm:$0xf] }
  0x50   : > { %667 = vmatpush.bf16.msra.mxu0 %v1629_v31  ;;  %v1999_v7 = vld [vmem:[#allocation7 + $0xd4] sm:$0xf0]  ;;  %v1861_v8 = vor.u32 %v1983_v4, %v1860_v3  ;;  %v1572_v10 = vld [vmem:[%s2467_s7 + $0x10] sm:$0xf]  ;;  %v1574_v13 = vld [vmem:[%s2467_s7 + $0x18] sm:$0xf0] }
  0x51   : > { %716 = vmatpush.bf16.msra.mxu1 %v1693_v35  ;;  %v1925_v9 = vor.u32 %v1999_v7, %v1924_v6  ;;  %v2007_v11 = vld [vmem:[%s2467_s7 + $0x14] sm:$0xf0]  ;;  %v1577_v15 = vor.u32 %v2006_v12, %v1574_v13  ;;  %v1980_v16 = vld [vmem:[#allocation7 + $0x44] sm:$0xf]  ;;  %v1854_v17 = vld [vmem:[#allocation7 + $0x48] sm:$0xf0] }
  0x52   : > { %765 = vmatpush.bf16.msra.mxu2 %v1633_v36  ;;  %v1573_v14 = vor.u32 %v2007_v11, %v1572_v10  ;;  %v1996_v18 = vld [vmem:[#allocation7 + $0xc4] sm:$0xf]  ;;  %v1857_v19 = vor.u32 %v1980_v16, %v1854_v17  ;;  %v1918_v20 = vld [vmem:[#allocation7 + $0xc8] sm:$0xf0]  ;;  %v1852_v21 = vld [vmem:[#allocation7 + $0x40] sm:$0xf] }
  0x53   : > { %814 = vmatpush.bf16.msra.mxu3 %v1697_v39  ;;  %668 = vmatmul.bf16.vlgmr.msra.gmra.mxu0 %v1565_v44  ;;  %v1981_v22 = vld [vmem:[#allocation7 + $0x44] sm:$0xf0]  ;;  %v1921_v23 = vor.u32 %v1996_v18, %v1918_v20  ;;  %v1916_v25 = vld [vmem:[#allocation7 + $0xc0] sm:$0xf]  ;;  %v2008_v30 = vld [vmem:[%s2467_s7 + $0x24] sm:$0xf] }
  0x54   : > { %717 = vmatmul.bf16.vlgmr.msra.gmra.mxu1 %v1569_v49  ;;  %1096 = vmatpush.bf16.msrb.mxu0 %v1877_v52  ;;  %v1853_v24 = vor.u32 %v1981_v22, %v1852_v21  ;;  %v1997_v26 = vld [vmem:[#allocation7 + $0xc4] sm:$0xf0]  ;;  %v1580_v28 = vld [vmem:[%s2467_s7 + $0x20] sm:$0xf]  ;;  %v1582_v31 = vld [vmem:[%s2467_s7 + $0x28] sm:$0xf0] }
  0x55   : > { %766 = vmatmul.bf16.vlgmr.msra.gmra.mxu2 %v1565_v44  ;;  %1145 = vmatpush.bf16.msrb.mxu1 %v1941_v53  ;;  %v1917_v27 = vor.u32 %v1997_v26, %v1916_v25  ;;  %v2009_v29 = vld [vmem:[%s2467_s7 + $0x24] sm:$0xf0]  ;;  %v1585_v33 = vor.u32 %v2008_v30, %v1582_v31  ;;  %v1978_v34 = vld [vmem:[#allocation7 + $0x34] sm:$0xf]  ;;  %v1846_v35 = vld [vmem:[#allocation7 + $0x38] sm:$0xf0] }
  0x56   : > { %1194 = vmatpush.bf16.msrb.mxu2 %v1881_v40  ;;  %815 = vmatmul.bf16.vlgmr.msra.gmra.mxu3 %v1569_v49  ;;  %v1581_v32 = vor.u32 %v2009_v29, %v1580_v28  ;;  %v1994_v36 = vld [vmem:[#allocation7 + $0xb4] sm:$0xf]  ;;  %v1849_v37 = vor.u32 %v1978_v34, %v1846_v35  ;;  %v1910_v38 = vld [vmem:[#allocation7 + $0xb8] sm:$0xf0]  ;;  %v1844_v39 = vld [vmem:[#allocation7 + $0x30] sm:$0xf] }
  0x57   : > { %1243 = vmatpush.bf16.msrb.mxu3 %v1945_v45  ;;  %v1979_v40 = vld [vmem:[#allocation7 + $0x34] sm:$0xf0]  ;;  %v1913_v41 = vor.u32 %v1994_v36, %v1910_v38  ;;  %v1908_v43 = vld [vmem:[#allocation7 + $0xb0] sm:$0xf]  ;;  %v2010_v48 = vld [vmem:[%s2467_s7 + $0x34] sm:$0xf] }
  0x58   : > { %1097 = vmatpush.bf16.msrb.mxu0 %v1869_v60  ;;  %v1845_v42 = vor.u32 %v1979_v40, %v1844_v39  ;;  %v1995_v44 = vld [vmem:[#allocation7 + $0xb4] sm:$0xf0]  ;;  %v1588_v46 = vld [vmem:[%s2467_s7 + $0x30] sm:$0xf]  ;;  %v1590_v49 = vld [vmem:[%s2467_s7 + $0x38] sm:$0xf0] }
  0x59   : > { %1146 = vmatpush.bf16.msrb.mxu1 %v1933_v0  ;;  %v1909_v45 = vor.u32 %v1995_v44, %v1908_v43  ;;  %v2011_v47 = vld [vmem:[%s2467_s7 + $0x34] sm:$0xf0]  ;;  %v1593_v51 = vor.u32 %v2010_v48, %v1590_v49  ;;  %v1976_v52 = vld [vmem:[#allocation7 + $0x24] sm:$0xf]  ;;  %v1838_v53 = vld [vmem:[#allocation7 + $0x28] sm:$0xf0] }
  0x5a   : > { %1195 = vmatpush.bf16.msrb.mxu2 %v1873_v54  ;;  %v1589_v50 = vor.u32 %v2011_v47, %v1588_v46  ;;  %v1992_v54 = vld [vmem:[#allocation7 + $0xa4] sm:$0xf]  ;;  %v1841_v55 = vor.u32 %v1976_v52, %v1838_v53  ;;  %v1902_v56 = vld [vmem:[#allocation7 + $0xa8] sm:$0xf0]  ;;  %v1977_v58 = vld [vmem:[#allocation7 + $0x24] sm:$0xf0] }
  0x5b   : > { %1244 = vmatpush.bf16.msrb.mxu3 %v1937_v57  ;;  %v1836_v57 = vld [vmem:[#allocation7 + $0x20] sm:$0xf]  ;;  %v1905_v59 = vor.u32 %v1992_v54, %v1902_v56  ;;  %v1993_v62 = vld [vmem:[#allocation7 + $0xa4] sm:$0xf0]  ;;  %v2012_v2 = vld [vmem:[%s2467_s7 + $0x44] sm:$0xf] }
  0x5c   : > { %1098 = vmatpush.bf16.msrb.mxu0 %v1861_v8  ;;  %v1837_v60 = vor.u32 %v1977_v58, %v1836_v57  ;;  %v1900_v61 = vld [vmem:[#allocation7 + $0xa0] sm:$0xf]  ;;  %v1598_v3 = vld [vmem:[%s2467_s7 + $0x48] sm:$0xf0]  ;;  %v1974_v6 = vld [vmem:[#allocation7 + $0x14] sm:$0xf] }
  0x5d   : > { %1147 = vmatpush.bf16.msrb.mxu1 %v1925_v9  ;;  %v1901_v63 = vor.u32 %v1993_v62, %v1900_v61  ;;  %v1596_v0 = vld [vmem:[%s2467_s7 + $0x40] sm:$0xf]  ;;  %v1830_v7 = vld [vmem:[#allocation7 + $0x18] sm:$0xf0]  ;;  %v1990_v8 = vld [vmem:[#allocation7 + $0x94] sm:$0xf] }
  0x5e   : > { %1196 = vmatpush.bf16.msrb.mxu2 %v1865_v1  ;;  %v2013_v1 = vld [vmem:[%s2467_s7 + $0x44] sm:$0xf0]  ;;  %v1833_v9 = vor.u32 %v1974_v6, %v1830_v7  ;;  %v1894_v10 = vld [vmem:[#allocation7 + $0x98] sm:$0xf0]  ;;  %v1828_v11 = vld [vmem:[#allocation7 + $0x10] sm:$0xf] }
  0x5f   : > { %1245 = vmatpush.bf16.msrb.mxu3 %v1929_v5  ;;  %v1597_v4 = vor.u32 %v2013_v1, %v1596_v0  ;;  %v1601_v5 = vor.u32 %v2012_v2, %v1598_v3  ;;  %v1975_v12 = vld [vmem:[#allocation7 + $0x14] sm:$0xf0]  ;;  %v1897_v13 = vor.u32 %v1990_v8, %v1894_v10  ;;  %v1604_v18 = vld [vmem:[%s2467_s7 + $0x50] sm:$0xf]  ;;  %v2014_v20 = vld [vmem:[%s2467_s7 + $0x54] sm:$0xf] }
  0x60   : > { %1099 = vmatpush.bf16.msrb.mxu0 %v1853_v24  ;;  %v1991_v16 = vld [vmem:[#allocation7 + $0x94] sm:$0xf0]  ;;  %v1606_v21 = vld [vmem:[%s2467_s7 + $0x58] sm:$0xf0]  ;;  %v1972_v24 = vld [vmem:[#allocation7 + $0x4] sm:$0xf] }
  0x61   : > { %1148 = vmatpush.bf16.msrb.mxu1 %v1917_v27  ;;  %v1822_v25 = vld [vmem:[#allocation7 + $0x8] sm:$0xf0]  ;;  %v1988_v26 = vld [vmem:[#allocation7 + $0x84] sm:$0xf]  ;;  %v1820_v29 = vld [vmem:[#allocation7] sm:$0xf] }
  0x62   : > { %1197 = vmatpush.bf16.msrb.mxu2 %v1857_v19  ;;  %v2015_v19 = vld [vmem:[%s2467_s7 + $0x54] sm:$0xf0]  ;;  %v1825_v27 = vor.u32 %v1972_v24, %v1822_v25  ;;  %v1886_v28 = vld [vmem:[#allocation7 + $0x88] sm:$0xf0]  ;;  %v1973_v30 = vld [vmem:[#allocation7 + $0x4] sm:$0xf0] }
  0x63   : > { %673 = vmatmul.bf16.gmra.mxu0 %v1573_v14  ;;  %1246 = vmatpush.bf16.msrb.mxu3 %v1921_v23  ;;  %v1605_v22 = vor.u32 %v2015_v19, %v1604_v18  ;;  %v1609_v23 = vor.u32 %v2014_v20, %v1606_v21  ;;  %v1889_v31 = vor.u32 %v1988_v26, %v1886_v28  ;;  %v1989_v34 = vld [vmem:[#allocation7 + $0x84] sm:$0xf0]  ;;  %v1612_v36 = vld [vmem:[%s2467_s7 + $0x60] sm:$0xf]  ;;  %v2016_v38 = vld [vmem:[%s2467_s7 + $0x64] sm:$0xf] }
  0x64   : > { %722 = vmatmul.bf16.gmra.mxu1 %v1577_v15  ;;  %1100 = vmatpush.bf16.msrb.mxu0 %v1845_v42  ;;  %v1614_v39 = vld [vmem:[%s2467_s7 + $0x68] sm:$0xf0]  ;;  %v1620_v42 = vld [vmem:[%s2467_s7 + $0x70] sm:$0xf]  ;;  %v2019_v43 = vld [vmem:[%s2467_s7 + $0x74] sm:$0xf0] }
  0x65   : > { %771 = vmatmul.bf16.gmra.mxu2 %v1573_v14  ;;  %1149 = vmatpush.bf16.msrb.mxu1 %v1909_v45  ;;  %v1829_v14 = vor.u32 %v1975_v12, %v1828_v11  ;;  %v2018_v44 = vld [vmem:[%s2467_s7 + $0x74] sm:$0xf]  ;;  %v1622_v45 = vld [vmem:[%s2467_s7 + $0x78] sm:$0xf0]  ;;  %v1621_v46 = vor.u32 %v2019_v43, %v1620_v42  ;;  %v1756_v48 = vld [vmem:[%s2460_s9] sm:$0xf] }
  0x66   : > { %820 = vmatmul.bf16.gmra.mxu3 %v1577_v15  ;;  %1198 = vmatpush.bf16.msrb.mxu2 %v1849_v37  ;;  %v1892_v15 = vld [vmem:[#allocation7 + $0x90] sm:$0xf]  ;;  %v2017_v37 = vld [vmem:[%s2467_s7 + $0x64] sm:$0xf0]  ;;  %v1625_v47 = vor.u32 %v2018_v44, %v1622_v45  ;;  %v1959_v0 = vld [vmem:[%s2460_s9 + $0x14] sm:$0xf0] }
  0x67   : > { %1247 = vmatpush.bf16.msrb.mxu3 %v1913_v41  ;;  %v1893_v17 = vor.u32 %v1991_v16, %v1892_v15  ;;  %v1613_v40 = vor.u32 %v2017_v37, %v1612_v36  ;;  %v1617_v41 = vor.u32 %v2016_v38, %v1614_v39  ;;  %v1957_v49 = vld [vmem:[%s2460_s9 + $0x4] sm:$0xf0]  ;;  %v1958_v1 = vld [vmem:[%s2460_s9 + $0x14] sm:$0xf]  ;;  %v1766_v2 = vld [vmem:[%s2460_s9 + $0x18] sm:$0xf0] }
  0x68   : > { %1101 = vmatpush.bf16.msrb.mxu0 %v1837_v60  ;;  %v1757_v52 = vor.u32 %v1957_v49, %v1756_v48  ;;  %v1769_v7 = vor.u32 %v1958_v1, %v1766_v2  ;;  %v1961_v18 = vld [vmem:[%s2460_s9 + $0x24] sm:$0xf0]  ;;  %v1960_v19 = vld [vmem:[%s2460_s9 + $0x24] sm:$0xf]  ;;  %v1774_v20 = vld [vmem:[%s2460_s9 + $0x28] sm:$0xf0] }
  0x69   : > { %1150 = vmatpush.bf16.msrb.mxu1 %v1901_v63  ;;  %v1764_v63 = vld [vmem:[%s2460_s9 + $0x10] sm:$0xf]  ;;  %v1777_v25 = vor.u32 %v1960_v19, %v1774_v20  ;;  %v1963_v36 = vld [vmem:[%s2460_s9 + $0x34] sm:$0xf0]  ;;  %v1962_v37 = vld [vmem:[%s2460_s9 + $0x34] sm:$0xf] }
  0x6a   : > { %1199 = vmatpush.bf16.msrb.mxu2 %v1841_v55  ;;  %v1782_v38 = vld [vmem:[%s2460_s9 + $0x38] sm:$0xf0]  ;;  %s1561_s12 = sshll.u32 %s2456_s2, 8  ;;  %s2053_s14 = sshll.u32 %s2308_s18, 8 }
  0x6b   : > { %1248 = vmatpush.bf16.msrb.mxu3 %v1905_v59  ;;  %v1785_v43 = vor.u32 %v1962_v37, %v1782_v38  ;;  %v1969_v37 = vld [vmem:[%s2460_s9 + $0x64] sm:$0xf0]  ;;  %v1968_v38 = vld [vmem:[%s2460_s9 + $0x64] sm:$0xf]  ;;  %s2616_s13 = scalar_lea.vmem [#allocation8], %s1561_s12  ;;  %s1409_s11 = scalar_lea.hbm %s2754_s4, %s2053_s14 }
  0x6c   : > { %1102 = vmatpush.bf16.msrb.mxu0 %v1829_v14  ;;  %s1410_s8 = sshll.u32 %s2616_s13, 4  ;;  %s1412_s18 = sshll.u32 %s1409_s11, 4  ;;  %s1411_s8 = int_to_ptr.vmem [resolvable:$true] %s1410_s8  ;;  %s1413_s18 = int_to_ptr.hbm [resolvable:$true] %s1412_s18 }
  0x6d   : > { %1151 = vmatpush.bf16.msrb.mxu1 %v1893_v17  ;;  %v1772_v17 = vld [vmem:[%s2460_s9 + $0x20] sm:$0xf]  ;;  %s1395_s25 = scalar_lea.sflag [#allocation4], %s2456_s2  ;;  %s2240_s26 = sshra.s32 %s1413_s18, 4  ;;  %s2241_s26 = int_to_ptr.hbm [resolvable:$true] %s2240_s26 }
  0x6e   : > { %1200 = vmatpush.bf16.msrb.mxu2 %v1833_v9  ;;  %s2242_s29 = scalar_lea.hbm %s2241_s26, 256  ;;  %s2246_s6 = scalar_lea.hbm %s2754_s4, 512 }
  0x6f   : > { %1249 = vmatpush.bf16.msrb.mxu3 %v1897_v13  ;;  %p2243_p1 = scmp.ne.s32.totalorder %s2241_s26, %s2242_s29  ;;  %p2247_p10 = scmp.lt.s32.totalorder %s2241_s26, %s2754_s4 }
  0x70   : > { %p2248_p12 = scmp.lt.s32.totalorder %s2246_s6, %s2242_s29 }
  0x71   : > { %p2244_p4 = pnand %p2243_p1, %p2426_p5 }
  0x72   : > { %1201 = vmatpush.bf16.msrb.mxu2 %v1825_v27  ;;  %p2249_p13 = por %p2248_p12, %p2247_p10 }
  0x73   : > { %678 = vmatmul.bf16.gmra.mxu0 %v1581_v32  ;;  %1250 = vmatpush.bf16.msrb.mxu3 %v1889_v31  ;;  %p2245_p8 = pneg %p2244_p4 }
  0x74   : > { %727 = vmatmul.bf16.gmra.mxu1 %v1585_v33 }
  0x75   : > { %776 = vmatmul.bf16.gmra.mxu2 %v1581_v32  ;;  %v1821_v32 = vor.u32 %v1973_v30, %v1820_v29  ;;  %p2250_p0 = pnand %p2249_p13, %p2245_p8 }
  0x76   : > { %825 = vmatmul.bf16.gmra.mxu3 %v1585_v33  ;;  %v1884_v33 = vld [vmem:[#allocation7 + $0x80] sm:$0xf] }
  0x77   : > { %v1885_v35 = vor.u32 %v1989_v34, %v1884_v33  ;;  %1103 = vmatpush.bf16.msrb.mxu0 %v1821_v32 }
  0x79   : > { %1152 = vmatpush.bf16.msrb.mxu1 %v1885_v35  ;;  %v1780_v35 = vld [vmem:[%s2460_s9 + $0x30] sm:$0xf] }
  0x83   : > { %683 = vmatmul.bf16.gmra.mxu0 %v1589_v50 }
  0x84   : > { %732 = vmatmul.bf16.gmra.mxu1 %v1593_v51 }
  0x85   : > { %781 = vmatmul.bf16.gmra.mxu2 %v1589_v50  ;;  %v1956_v50 = vld [vmem:[%s2460_s9 + $0x4] sm:$0xf] }
  0x86   : > { %830 = vmatmul.bf16.gmra.mxu3 %v1593_v51  ;;  %v1758_v51 = vld [vmem:[%s2460_s9 + $0x8] sm:$0xf0] }
  0x87   : > { %v1761_v54 = vor.u32 %v1956_v50, %v1758_v51 }
  0x93   : > { %688 = vmatmul.bf16.gmra.mxu0 %v1597_v4 }
  0x94   : > { %737 = vmatmul.bf16.gmra.mxu1 %v1601_v5 }
  0x95   : > { %786 = vmatmul.bf16.gmra.mxu2 %v1597_v4  ;;  %v1765_v4 = vor.u32 %v1959_v0, %v1764_v63 }
  0x96   : > { %835 = vmatmul.bf16.gmra.mxu3 %v1601_v5 }
  0xa3   : > { %693 = vmatmul.bf16.gmra.mxu0 %v1605_v22 }
  0xa4   : > { %742 = vmatmul.bf16.gmra.mxu1 %v1609_v23 }
  0xa5   : > { %791 = vmatmul.bf16.gmra.mxu2 %v1605_v22  ;;  %v1773_v22 = vor.u32 %v1961_v18, %v1772_v17  ;;  %v1798_v17 = vld [vmem:[%s2460_s9 + $0x58] sm:$0xf0] }
  0xa6   : > { %840 = vmatmul.bf16.gmra.mxu3 %v1609_v23 }
  0xb3   : > { %698 = vmatmul.bf16.gmra.mxu0 %v1613_v40 }
  0xb4   : > { %747 = vmatmul.bf16.gmra.mxu1 %v1617_v41 }
  0xb5   : > { %796 = vmatmul.bf16.gmra.mxu2 %v1613_v40  ;;  %v1781_v40 = vor.u32 %v1963_v36, %v1780_v35  ;;  %v1804_v36 = vld [vmem:[%s2460_s9 + $0x60] sm:$0xf] }
  0xb6   : > { %845 = vmatmul.bf16.gmra.mxu3 %v1617_v41 }
  0xc3   : > { %703 = vmatmul.bf16.gmra.mxu0 %v1621_v46 }
  0xc4   : > { %752 = vmatmul.bf16.gmra.mxu1 %v1625_v47 }
  0xc5   : > { %801 = vmatmul.bf16.gmra.mxu2 %v1621_v46 }
  0xc6   : > { %850 = vmatmul.bf16.gmra.mxu3 %v1625_v47 }
  0xd0   : > { %v669_v53 = vpop.f32.mrf.mxu0 }
  0xd1   : > { %v718_v55 = vpop.f32.mrf.mxu1 }
  0xd2   : > { %v2513_v56 = vadd.f32 %v718_v55, %v669_v53  ;;  %v1788_v53 = vld [vmem:[%s2460_s9 + $0x40] sm:$0xf]  ;;  %v1964_v55 = vld [vmem:[%s2460_s9 + $0x44] sm:$0xf] }
  0xd3   : > { %1104 = vmatmul.bf16.vlgmr.msrb.gmra.mxu0 %v1757_v52 }
  0xd4   : > { %1153 = vmatmul.bf16.vlgmr.msrb.gmra.mxu1 %v1761_v54 }
  0xd5   : > { %1202 = vmatmul.bf16.vlgmr.msrb.gmra.mxu2 %v1757_v52 }
  0xd6   : > { %1251 = vmatmul.bf16.vlgmr.msrb.gmra.mxu3 %v1761_v54  ;;  %v1965_v54 = vld [vmem:[%s2460_s9 + $0x44] sm:$0xf0] }
  0xd8   : > { %v767_v57 = vpop.f32.mrf.mxu2  ;;  %v671_v59 = vpop.f32.mrf.mxu0 }
  0xd9   : > { %v816_v58 = vpop.f32.mrf.mxu3  ;;  %v720_v61 = vpop.f32.mrf.mxu1 }
  0xda   : > { %v2515_v60 = vadd.f32 %v816_v58, %v767_v57  ;;  %v2517_v62 = vadd.f32 %v720_v61, %v671_v59  ;;  %v1790_v57 = vld [vmem:[%s2460_s9 + $0x48] sm:$0xf0]  ;;  %v1789_v59 = vor.u32 %v1965_v54, %v1788_v53 }
  0xdb   : > { %v1793_v0 = vor.u32 %v1964_v55, %v1790_v57 }
  0xe0   : > { %v769_v3 = vpop.f32.mrf.mxu2  ;;  %v674_v6 = vpop.f32.mrf.mxu0 }
  0xe1   : > { %v818_v5 = vpop.f32.mrf.mxu3  ;;  %v723_v9 = vpop.f32.mrf.mxu1 }
  0xe2   : > { %v2523_v8 = vadd.f32 %v818_v5, %v769_v3  ;;  %v2525_v10 = vadd.f32 %v723_v9, %v674_v6 }
  0xe3   : > { %1109 = vmatmul.bf16.gmra.mxu0 %v1765_v4 }
  0xe4   : > { %1158 = vmatmul.bf16.gmra.mxu1 %v1769_v7 }
  0xe5   : > { %1207 = vmatmul.bf16.gmra.mxu2 %v1765_v4 }
  0xe6   : > { %1256 = vmatmul.bf16.gmra.mxu3 %v1769_v7 }
  0xe8   : > { %v772_v11 = vpop.f32.mrf.mxu2  ;;  %v676_v13 = vpop.f32.mrf.mxu0 }
  0xe9   : > { %v821_v12 = vpop.f32.mrf.mxu3  ;;  %v725_v15 = vpop.f32.mrf.mxu1 }
  0xea   : > { %v2527_v14 = vadd.f32 %v821_v12, %v772_v11  ;;  %v2529_v16 = vadd.f32 %v725_v15, %v676_v13  ;;  %v1796_v12 = vld [vmem:[%s2460_s9 + $0x50] sm:$0xf]  ;;  %v1967_v13 = vld [vmem:[%s2460_s9 + $0x54] sm:$0xf0]  ;;  %v1966_v15 = vld [vmem:[%s2460_s9 + $0x54] sm:$0xf] }
  0xeb   : > { %v1797_v19 = vor.u32 %v1967_v13, %v1796_v12 }
  0xf0   : > { %v774_v21 = vpop.f32.mrf.mxu2  ;;  %v679_v24 = vpop.f32.mrf.mxu0 }
  0xf1   : > { %v823_v23 = vpop.f32.mrf.mxu3  ;;  %v728_v27 = vpop.f32.mrf.mxu1 }
  0xf2   : > { %v2535_v26 = vadd.f32 %v823_v23, %v774_v21  ;;  %v2537_v28 = vadd.f32 %v728_v27, %v679_v24 }
  0xf3   : > { %1114 = vmatmul.bf16.gmra.mxu0 %v1773_v22 }
  0xf4   : > { %1163 = vmatmul.bf16.gmra.mxu1 %v1777_v25 }
  0xf5   : > { %1212 = vmatmul.bf16.gmra.mxu2 %v1773_v22  ;;  %v1801_v22 = vor.u32 %v1966_v15, %v1798_v17 }
  0xf6   : > { %1261 = vmatmul.bf16.gmra.mxu3 %v1777_v25 }
  0xf8   : > { %v777_v29 = vpop.f32.mrf.mxu2  ;;  %v681_v31 = vpop.f32.mrf.mxu0 }
  0xf9   : > { %v826_v30 = vpop.f32.mrf.mxu3  ;;  %v730_v33 = vpop.f32.mrf.mxu1 }
  0xfa   : > { %v2539_v32 = vadd.f32 %v826_v30, %v777_v29  ;;  %v2541_v34 = vadd.f32 %v730_v33, %v681_v31 }
 0x100   : > { %v779_v39 = vpop.f32.mrf.mxu2  ;;  %v684_v42 = vpop.f32.mrf.mxu0 }
 0x101   : > { %v828_v41 = vpop.f32.mrf.mxu3  ;;  %v733_v45 = vpop.f32.mrf.mxu1 }
 0x102   : > { %v2547_v44 = vadd.f32 %v828_v41, %v779_v39  ;;  %v2549_v46 = vadd.f32 %v733_v45, %v684_v42  ;;  %v1806_v39 = vld [vmem:[%s2460_s9 + $0x68] sm:$0xf0]  ;;  %v1805_v41 = vor.u32 %v1969_v37, %v1804_v36 }
 0x103   : > { %1119 = vmatmul.bf16.gmra.mxu0 %v1781_v40  ;;  %v1809_v45 = vor.u32 %v1968_v38, %v1806_v39 }
 0x104   : > { %1168 = vmatmul.bf16.gmra.mxu1 %v1785_v43 }
 0x105   : > { %1217 = vmatmul.bf16.gmra.mxu2 %v1781_v40 }
 0x106   : > { %1266 = vmatmul.bf16.gmra.mxu3 %v1785_v43 }
 0x108   : > { %v782_v47 = vpop.f32.mrf.mxu2  ;;  %v686_v49 = vpop.f32.mrf.mxu0 }
 0x109   : > { %v831_v48 = vpop.f32.mrf.mxu3  ;;  %v735_v51 = vpop.f32.mrf.mxu1 }
 0x10a   : > { %v2551_v50 = vadd.f32 %v831_v48, %v782_v47  ;;  %v2553_v52 = vadd.f32 %v735_v51, %v686_v49 }
 0x110   : > { %v784_v58 = vpop.f32.mrf.mxu2  ;;  %v689_v63 = vpop.f32.mrf.mxu0 }
 0x111   : > { %v833_v61 = vpop.f32.mrf.mxu3  ;;  %v738_v2 = vpop.f32.mrf.mxu1 }
 0x112   : > { %v2559_v1 = vadd.f32 %v833_v61, %v784_v58  ;;  %v2561_v3 = vadd.f32 %v738_v2, %v689_v63  ;;  %v1971_v61 = vld [vmem:[%s2460_s9 + $0x74] sm:$0xf0]  ;;  %v1970_v63 = vld [vmem:[%s2460_s9 + $0x74] sm:$0xf] }
 0x113   : > { %1124 = vmatmul.bf16.gmra.mxu0 %v1789_v59 }
 0x114   : > { %1173 = vmatmul.bf16.gmra.mxu1 %v1793_v0 }
 0x115   : > { %1222 = vmatmul.bf16.gmra.mxu2 %v1789_v59  ;;  %v1812_v59 = vld [vmem:[%s2460_s9 + $0x70] sm:$0xf] }
 0x116   : > { %1271 = vmatmul.bf16.gmra.mxu3 %v1793_v0  ;;  %v1814_v0 = vld [vmem:[%s2460_s9 + $0x78] sm:$0xf0] }
 0x118   : > { %v787_v4 = vpop.f32.mrf.mxu2  ;;  %v691_v6 = vpop.f32.mrf.mxu0 }
 0x119   : > { %v836_v5 = vpop.f32.mrf.mxu3  ;;  %v740_v9 = vpop.f32.mrf.mxu1 }
 0x11a   : > { %v2563_v7 = vadd.f32 %v836_v5, %v787_v4  ;;  %v2565_v11 = vadd.f32 %v740_v9, %v691_v6  ;;  %v1813_v4 = vor.u32 %v1971_v61, %v1812_v59  ;;  %v1817_v9 = vor.u32 %v1970_v63, %v1814_v0 }
 0x120   : > { %v789_v18 = vpop.f32.mrf.mxu2  ;;  %v694_v21 = vpop.f32.mrf.mxu0 }
 0x121   : > { %v838_v20 = vpop.f32.mrf.mxu3  ;;  %v743_v24 = vpop.f32.mrf.mxu1 }
 0x122   : > { %v2571_v23 = vadd.f32 %v838_v20, %v789_v18  ;;  %v2573_v25 = vadd.f32 %v743_v24, %v694_v21  ;;  %v1292_v24 = vld [vmem:[%s2753_s3] sm:$0x3] }
 0x123   : > { %1129 = vmatmul.bf16.gmra.mxu0 %v1797_v19  ;;  %v2609_v38 = vperm.slane %v1292_v24, 0 }
 0x124   : > { %1178 = vmatmul.bf16.gmra.mxu1 %v1801_v22 }
 0x125   : > { %1227 = vmatmul.bf16.gmra.mxu2 %v1797_v19 }
 0x126   : > { %1276 = vmatmul.bf16.gmra.mxu3 %v1801_v22 }
 0x128   : > { %v792_v27 = vpop.f32.mrf.mxu2  ;;  %v696_v30 = vpop.f32.mrf.mxu0 }
 0x129   : > { %v841_v29 = vpop.f32.mrf.mxu3  ;;  %v745_v33 = vpop.f32.mrf.mxu1 }
 0x12a   : > { %v2575_v31 = vadd.f32 %v841_v29, %v792_v27  ;;  %v2577_v35 = vadd.f32 %v745_v33, %v696_v30 }
 0x130   : > { %v794_v40 = vpop.f32.mrf.mxu2  ;;  %v699_v43 = vpop.f32.mrf.mxu0 }
 0x131   : > { %v843_v42 = vpop.f32.mrf.mxu3  ;;  %v748_v48 = vpop.f32.mrf.mxu1 }
 0x132   : > { %v2583_v47 = vadd.f32 %v843_v42, %v794_v40  ;;  %v2585_v49 = vadd.f32 %v748_v48, %v699_v43  ;;  %v2614_v48 = vperm.slane %v1292_v24, 1 }
 0x133   : > { %1134 = vmatmul.bf16.gmra.mxu0 %v1805_v41 }
 0x134   : > { %1183 = vmatmul.bf16.gmra.mxu1 %v1809_v45 }
 0x135   : > { %1232 = vmatmul.bf16.gmra.mxu2 %v1805_v41 }
 0x136   : > { %1281 = vmatmul.bf16.gmra.mxu3 %v1809_v45 }
 0x138   : > { %v797_v51 = vpop.f32.mrf.mxu2  ;;  %v701_v54 = vpop.f32.mrf.mxu0 }
 0x139   : > { %v846_v53 = vpop.f32.mrf.mxu3  ;;  %v750_v57 = vpop.f32.mrf.mxu1 }
 0x13a   : > { %v2587_v55 = vadd.f32 %v846_v53, %v797_v51  ;;  %v2589_v58 = vadd.f32 %v750_v57, %v701_v54 }
 0x140   : > { %v799_v2 = vpop.f32.mrf.mxu2  ;;  %v704_v6 = vpop.f32.mrf.mxu0 }
 0x141   : > { %v848_v5 = vpop.f32.mrf.mxu3  ;;  %v753_v13 = vpop.f32.mrf.mxu1 }
 0x142   : > { %v2595_v12 = vadd.f32 %v848_v5, %v799_v2  ;;  %v2597_v15 = vadd.f32 %v753_v13, %v704_v6 }
 0x143   : > { %1139 = vmatmul.bf16.gmra.mxu0 %v1813_v4 }
 0x144   : > { %1188 = vmatmul.bf16.gmra.mxu1 %v1817_v9 }
 0x145   : > { %1237 = vmatmul.bf16.gmra.mxu2 %v1813_v4 }
 0x146   : > { %1286 = vmatmul.bf16.gmra.mxu3 %v1817_v9 }
 0x148   : > { %v802_v17 = vpop.f32.mrf.mxu2  ;;  %v706_v19 = vpop.f32.mrf.mxu0 }
 0x149   : > { %v851_v18 = vpop.f32.mrf.mxu3  ;;  %v755_v21 = vpop.f32.mrf.mxu1 }
 0x14a   : > { %v2599_v20 = vadd.f32 %v851_v18, %v802_v17  ;;  %v2601_v22 = vadd.f32 %v755_v21, %v706_v19 }
 0x150   : > { %v804_v27 = vpop.f32.mrf.mxu2  ;;  %v1105_v30 = vpop.f32.mrf.mxu0 }
 0x151   : > { %v853_v29 = vpop.f32.mrf.mxu3  ;;  %v1106_v36 = vadd.f32 %v1105_v30, %v2513_v56  ;;  %v1154_v37 = vpop.f32.mrf.mxu1 }
 0x152   : > { %v2606_v33 = vadd.f32 %v853_v29, %v804_v27 }
 0x153   : > { %v1155_v39 = vadd.f32 %v1154_v37, %v1106_v36 }
 0x155   : > { %v1298_v40 = vadd.f32 %v2609_v38, %v1155_v39 }
 0x157   : > { %v1330_v41 = vmax.f32 %v1298_v40, 0.0 }
 0x158   : > { %v1203_v42 = vpop.f32.mrf.mxu2  ;;  %v1107_v51 = vpop.f32.mrf.mxu0 }
 0x159   : > { %v1204_v43 = vadd.f32 %v1203_v42, %v2515_v60  ;;  %v1252_v45 = vpop.f32.mrf.mxu3  ;;  %1362 = vst [vmem:[%s2616_s13] sm:$0xff] %v1330_v41  ;;  %v1108_v56 = vadd.f32 %v1107_v51, %v2517_v62  ;;  %v1156_v53 = vpop.f32.mrf.mxu1 }
 0x15b   : > { %v1253_v54 = vadd.f32 %v1252_v45, %v1204_v43  ;;  %v1157_v57 = vadd.f32 %v1156_v53, %v1108_v56 }
 0x15d   : > { %v1299_v59 = vadd.f32 %v2614_v48, %v1253_v54  ;;  %v1300_v61 = vadd.f32 %v2609_v38, %v1157_v57 }
 0x15f   : > { %v1331_v60 = vmax.f32 %v1299_v59, 0.0  ;;  %v1332_v63 = vmax.f32 %v1300_v61, 0.0 }
 0x160   : > { %v1205_v0 = vpop.f32.mrf.mxu2  ;;  %v1110_v5 = vpop.f32.mrf.mxu0 }
 0x161   : > { %1363 = vst [vmem:[%s2616_s13 + $0x8] sm:$0xff] %v1331_v60  ;;  %v1206_v2 = vadd.f32 %v1205_v0, %v2523_v8  ;;  %v1254_v4 = vpop.f32.mrf.mxu3  ;;  %v1111_v62 = vadd.f32 %v1110_v5, %v2525_v10  ;;  %v1159_v6 = vpop.f32.mrf.mxu1 }
 0x162   : > { %1364 = vst [vmem:[%s2616_s13 + $0x10] sm:$0xff] %v1332_v63 }
 0x163   : > { %v1255_v9 = vadd.f32 %v1254_v4, %v1206_v2  ;;  %v1160_v13 = vadd.f32 %v1159_v6, %v1111_v62 }
 0x165   : > { %v1301_v17 = vadd.f32 %v2614_v48, %v1255_v9  ;;  %v1302_v18 = vadd.f32 %v2609_v38, %v1160_v13 }
 0x167   : > { %v1333_v19 = vmax.f32 %v1301_v17, 0.0  ;;  %v1334_v21 = vmax.f32 %v1302_v18, 0.0 }
 0x168   : > { %v1208_v24 = vpop.f32.mrf.mxu2  ;;  %v1112_v29 = vpop.f32.mrf.mxu0 }
 0x169   : > { %1365 = vst [vmem:[%s2616_s13 + $0x18] sm:$0xff] %v1333_v19  ;;  %v1209_v8 = vadd.f32 %v1208_v24, %v2527_v14  ;;  %v1257_v27 = vpop.f32.mrf.mxu3  ;;  %v1113_v10 = vadd.f32 %v1112_v29, %v2529_v16  ;;  %v1161_v30 = vpop.f32.mrf.mxu1 }
 0x16a   : > { %1366 = vst [vmem:[%s2616_s13 + $0x20] sm:$0xff] %v1334_v21 }
 0x16b   : > { %v1258_v36 = vadd.f32 %v1257_v27, %v1209_v8  ;;  %v1162_v37 = vadd.f32 %v1161_v30, %v1113_v10 }
 0x16d   : > { %v1303_v39 = vadd.f32 %v2614_v48, %v1258_v36  ;;  %v1304_v40 = vadd.f32 %v2609_v38, %v1162_v37 }
 0x16f   : > { %v1335_v41 = vmax.f32 %v1303_v39, 0.0  ;;  %v1336_v42 = vmax.f32 %v1304_v40, 0.0 }
 0x170   : > { %v1210_v43 = vpop.f32.mrf.mxu2  ;;  %v1115_v51 = vpop.f32.mrf.mxu0 }
 0x171   : > { %1367 = vst [vmem:[%s2616_s13 + $0x28] sm:$0xff] %v1335_v41  ;;  %v1211_v14 = vadd.f32 %v1210_v43, %v2535_v26  ;;  %v1259_v45 = vpop.f32.mrf.mxu3  ;;  %v1116_v16 = vadd.f32 %v1115_v51, %v2537_v28  ;;  %v1164_v56 = vpop.f32.mrf.mxu1 }
 0x172   : > { %1368 = vst [vmem:[%s2616_s13 + $0x30] sm:$0xff] %v1336_v42 }
 0x173   : > { %v1260_v53 = vadd.f32 %v1259_v45, %v1211_v14  ;;  %v1165_v54 = vadd.f32 %v1164_v56, %v1116_v16 }
 0x175   : > { %v1305_v57 = vadd.f32 %v2614_v48, %v1260_v53  ;;  %v1306_v59 = vadd.f32 %v2609_v38, %v1165_v54 }
 0x177   : > { %v1337_v61 = vmax.f32 %v1305_v57, 0.0  ;;  %v1338_v60 = vmax.f32 %v1306_v59, 0.0 }
 0x178   : > { %v1213_v63 = vpop.f32.mrf.mxu2  ;;  %v1117_v2 = vpop.f32.mrf.mxu0 }
 0x179   : > { %1369 = vst [vmem:[%s2616_s13 + $0x38] sm:$0xff] %v1337_v61  ;;  %v1214_v26 = vadd.f32 %v1213_v63, %v2539_v32  ;;  %v1262_v0 = vpop.f32.mrf.mxu3  ;;  %v1118_v28 = vadd.f32 %v1117_v2, %v2541_v34  ;;  %v1166_v4 = vpop.f32.mrf.mxu1 }
 0x17a   : > { %1370 = vst [vmem:[%s2616_s13 + $0x40] sm:$0xff] %v1338_v60 }
 0x17b   : > { %v1263_v5 = vadd.f32 %v1262_v0, %v1214_v26  ;;  %v1167_v62 = vadd.f32 %v1166_v4, %v1118_v28 }
 0x17d   : > { %v1307_v6 = vadd.f32 %v2614_v48, %v1263_v5  ;;  %v1308_v9 = vadd.f32 %v2609_v38, %v1167_v62 }
 0x17f   : > { %v1339_v13 = vmax.f32 %v1307_v6, 0.0  ;;  %v1340_v17 = vmax.f32 %v1308_v9, 0.0 }
 0x180   : > { %v1215_v18 = vpop.f32.mrf.mxu2  ;;  %v1120_v21 = vpop.f32.mrf.mxu0 }
 0x181   : > { %1371 = vst [vmem:[%s2616_s13 + $0x48] sm:$0xff] %v1339_v13  ;;  %v1216_v32 = vadd.f32 %v1215_v18, %v2547_v44  ;;  %v1264_v19 = vpop.f32.mrf.mxu3  ;;  %v1121_v34 = vadd.f32 %v1120_v21, %v2549_v46  ;;  %v1169_v24 = vpop.f32.mrf.mxu1 }
 0x182   : > { %1372 = vst [vmem:[%s2616_s13 + $0x50] sm:$0xff] %v1340_v17 }
 0x183   : > { %v1265_v8 = vadd.f32 %v1264_v19, %v1216_v32  ;;  %v1170_v27 = vadd.f32 %v1169_v24, %v1121_v34 }
 0x185   : > { %v1309_v29 = vadd.f32 %v2614_v48, %v1265_v8  ;;  %v1310_v10 = vadd.f32 %v2609_v38, %v1170_v27 }
 0x187   : > { %v1341_v30 = vmax.f32 %v1309_v29, 0.0  ;;  %v1342_v36 = vmax.f32 %v1310_v10, 0.0 }
 0x188   : > { %v1218_v37 = vpop.f32.mrf.mxu2  ;;  %v1122_v40 = vpop.f32.mrf.mxu0 }
 0x189   : > { %1373 = vst [vmem:[%s2616_s13 + $0x58] sm:$0xff] %v1341_v30  ;;  %v1219_v44 = vadd.f32 %v1218_v37, %v2551_v50  ;;  %v1267_v39 = vpop.f32.mrf.mxu3  ;;  %v1123_v46 = vadd.f32 %v1122_v40, %v2553_v52  ;;  %v1171_v41 = vpop.f32.mrf.mxu1 }
 0x18a   : > { %1374 = vst [vmem:[%s2616_s13 + $0x60] sm:$0xff] %v1342_v36 }
 0x18b   : > { %v1268_v42 = vadd.f32 %v1267_v39, %v1219_v44  ;;  %v1172_v43 = vadd.f32 %v1171_v41, %v1123_v46 }
 0x18d   : > { %v1311_v14 = vadd.f32 %v2614_v48, %v1268_v42  ;;  %v1312_v45 = vadd.f32 %v2609_v38, %v1172_v43 }
 0x18f   : > { %v1343_v51 = vmax.f32 %v1311_v14, 0.0  ;;  %v1344_v16 = vmax.f32 %v1312_v45, 0.0 }
 0x190   : > { %v1220_v56 = vpop.f32.mrf.mxu2  ;;  %v1125_v54 = vpop.f32.mrf.mxu0 }
 0x191   : > { %1375 = vst [vmem:[%s2616_s13 + $0x68] sm:$0xff] %v1343_v51  ;;  %v1221_v50 = vadd.f32 %v1220_v56, %v2559_v1  ;;  %v1269_v53 = vpop.f32.mrf.mxu3  ;;  %v1126_v52 = vadd.f32 %v1125_v54, %v2561_v3  ;;  %v1174_v57 = vpop.f32.mrf.mxu1 }
 0x192   : > { %1376 = vst [vmem:[%s2616_s13 + $0x70] sm:$0xff] %v1344_v16 }
 0x193   : > { %v1270_v59 = vadd.f32 %v1269_v53, %v1221_v50  ;;  %v1175_v61 = vadd.f32 %v1174_v57, %v1126_v52 }
 0x195   : > { %v1313_v60 = vadd.f32 %v2614_v48, %v1270_v59  ;;  %v1314_v63 = vadd.f32 %v2609_v38, %v1175_v61 }
 0x197   : > { %v1345_v26 = vmax.f32 %v1313_v60, 0.0  ;;  %v1346_v0 = vmax.f32 %v1314_v63, 0.0 }
 0x198   : > { %v1223_v2 = vpop.f32.mrf.mxu2  ;;  %v1127_v4 = vpop.f32.mrf.mxu0 }
 0x199   : > { %1377 = vst [vmem:[%s2616_s13 + $0x78] sm:$0xff] %v1345_v26  ;;  %v1224_v1 = vadd.f32 %v1223_v2, %v2563_v7  ;;  %v1272_v28 = vpop.f32.mrf.mxu3  ;;  %v1128_v3 = vadd.f32 %v1127_v4, %v2565_v11  ;;  %v1176_v5 = vpop.f32.mrf.mxu1 }
 0x19a   : > { %1378 = vst [vmem:[%s2616_s13 + $0x80] sm:$0xff] %v1346_v0 }
 0x19b   : > { %v1273_v62 = vadd.f32 %v1272_v28, %v1224_v1  ;;  %v1177_v6 = vadd.f32 %v1176_v5, %v1128_v3 }
 0x19d   : > { %v1315_v9 = vadd.f32 %v2614_v48, %v1273_v62  ;;  %v1316_v13 = vadd.f32 %v2609_v38, %v1177_v6 }
 0x19f   : > { %v1347_v17 = vmax.f32 %v1315_v9, 0.0  ;;  %v1348_v18 = vmax.f32 %v1316_v13, 0.0 }
 0x1a0   : > { %v1225_v32 = vpop.f32.mrf.mxu2  ;;  %v1130_v21 = vpop.f32.mrf.mxu0 }
 0x1a1   : > { %1379 = vst [vmem:[%s2616_s13 + $0x88] sm:$0xff] %v1347_v17  ;;  %v1226_v7 = vadd.f32 %v1225_v32, %v2571_v23  ;;  %v1274_v19 = vpop.f32.mrf.mxu3  ;;  %v1131_v11 = vadd.f32 %v1130_v21, %v2573_v25  ;;  %v1179_v34 = vpop.f32.mrf.mxu1 }
 0x1a2   : > { %1380 = vst [vmem:[%s2616_s13 + $0x90] sm:$0xff] %v1348_v18 }
 0x1a3   : > { %v1275_v24 = vadd.f32 %v1274_v19, %v1226_v7  ;;  %v1180_v8 = vadd.f32 %v1179_v34, %v1131_v11 }
 0x1a5   : > { %v1317_v27 = vadd.f32 %v2614_v48, %v1275_v24  ;;  %v1318_v29 = vadd.f32 %v2609_v38, %v1180_v8 }
 0x1a7   : > { %v1349_v10 = vmax.f32 %v1317_v27, 0.0  ;;  %v1350_v30 = vmax.f32 %v1318_v29, 0.0 }
 0x1a8   : > { %v1228_v36 = vpop.f32.mrf.mxu2  ;;  %v1132_v44 = vpop.f32.mrf.mxu0 }
 0x1a9   : > { %1381 = vst [vmem:[%s2616_s13 + $0x98] sm:$0xff] %v1349_v10  ;;  %v1229_v23 = vadd.f32 %v1228_v36, %v2575_v31  ;;  %v1277_v37 = vpop.f32.mrf.mxu3  ;;  %v1133_v25 = vadd.f32 %v1132_v44, %v2577_v35  ;;  %v1181_v39 = vpop.f32.mrf.mxu1 }
 0x1aa   : > { %1382 = vst [vmem:[%s2616_s13 + $0xa0] sm:$0xff] %v1350_v30 }
 0x1ab   : > { %v1278_v40 = vadd.f32 %v1277_v37, %v1229_v23  ;;  %v1182_v46 = vadd.f32 %v1181_v39, %v1133_v25 }
 0x1ad   : > { %v1319_v41 = vadd.f32 %v2614_v48, %v1278_v40  ;;  %v1320_v42 = vadd.f32 %v2609_v38, %v1182_v46 }
 0x1af   : > { %v1351_v43 = vmax.f32 %v1319_v41, 0.0  ;;  %v1352_v14 = vmax.f32 %v1320_v42, 0.0 }
 0x1b0   : > { %v1230_v45 = vpop.f32.mrf.mxu2  ;;  %v1135_v16 = vpop.f32.mrf.mxu0 }
 0x1b1   : > { %1383 = vst [vmem:[%s2616_s13 + $0xa8] sm:$0xff] %v1351_v43  ;;  %v1231_v31 = vadd.f32 %v1230_v45, %v2583_v47  ;;  %v1279_v51 = vpop.f32.mrf.mxu3  ;;  %v1136_v35 = vadd.f32 %v1135_v16, %v2585_v49  ;;  %v1184_v56 = vpop.f32.mrf.mxu1 }
 0x1b2   : > { %1384 = vst [vmem:[%s2616_s13 + $0xb0] sm:$0xff] %v1352_v14 }
 0x1b3   : > { %v1280_v50 = vadd.f32 %v1279_v51, %v1231_v31  ;;  %v1185_v53 = vadd.f32 %v1184_v56, %v1136_v35 }
 0x1b5   : > { %v1321_v54 = vadd.f32 %v2614_v48, %v1280_v50  ;;  %v1322_v52 = vadd.f32 %v2609_v38, %v1185_v53 }
 0x1b7   : > { %v1353_v57 = vmax.f32 %v1321_v54, 0.0  ;;  %v1354_v59 = vmax.f32 %v1322_v52, 0.0 }
 0x1b8   : > { %v1233_v61 = vpop.f32.mrf.mxu2  ;;  %v1137_v63 = vpop.f32.mrf.mxu0 }
 0x1b9   : > { %1385 = vst [vmem:[%s2616_s13 + $0xb8] sm:$0xff] %v1353_v57  ;;  %v1234_v47 = vadd.f32 %v1233_v61, %v2587_v55  ;;  %v1282_v60 = vpop.f32.mrf.mxu3  ;;  %v1138_v49 = vadd.f32 %v1137_v63, %v2589_v58  ;;  %v1186_v26 = vpop.f32.mrf.mxu1 }
 0x1ba   : > { %1386 = vst [vmem:[%s2616_s13 + $0xc0] sm:$0xff] %v1354_v59 }
 0x1bb   : > { %v1283_v0 = vadd.f32 %v1282_v60, %v1234_v47  ;;  %v1187_v2 = vadd.f32 %v1186_v26, %v1138_v49 }
 0x1bd   : > { %v1323_v1 = vadd.f32 %v2614_v48, %v1283_v0  ;;  %v1324_v28 = vadd.f32 %v2609_v38, %v1187_v2 }
 0x1bf   : > { %v1355_v4 = vmax.f32 %v1323_v1, 0.0  ;;  %v1356_v3 = vmax.f32 %v1324_v28, 0.0 }
 0x1c0   : > { %v1235_v5 = vpop.f32.mrf.mxu2  ;;  %v1140_v6 = vpop.f32.mrf.mxu0 }
 0x1c1   : > { %1387 = vst [vmem:[%s2616_s13 + $0xc8] sm:$0xff] %v1355_v4  ;;  %v1236_v55 = vadd.f32 %v1235_v5, %v2595_v12  ;;  %v1284_v62 = vpop.f32.mrf.mxu3  ;;  %v1141_v58 = vadd.f32 %v1140_v6, %v2597_v15  ;;  %v1189_v9 = vpop.f32.mrf.mxu1 }
 0x1c2   : > { %1388 = vst [vmem:[%s2616_s13 + $0xd0] sm:$0xff] %v1356_v3 }
 0x1c3   : > { %v1285_v13 = vadd.f32 %v1284_v62, %v1236_v55  ;;  %v1190_v17 = vadd.f32 %v1189_v9, %v1141_v58 }
 0x1c5   : > { %v1325_v18 = vadd.f32 %v2614_v48, %v1285_v13  ;;  %v1326_v32 = vadd.f32 %v2609_v38, %v1190_v17 }
 0x1c7   : > { %v1357_v7 = vmax.f32 %v1325_v18, 0.0  ;;  %v1358_v19 = vmax.f32 %v1326_v32, 0.0 }
 0x1c8   : > { %v1238_v21 = vpop.f32.mrf.mxu2  ;;  %v1142_v34 = vpop.f32.mrf.mxu0 }
 0x1c9   : > { %1389 = vst [vmem:[%s2616_s13 + $0xd8] sm:$0xff] %v1357_v7  ;;  %v1239_v12 = vadd.f32 %v1238_v21, %v2599_v20  ;;  %v1287_v11 = vpop.f32.mrf.mxu3  ;;  %v1143_v15 = vadd.f32 %v1142_v34, %v2601_v22  ;;  %v1191_v8 = vpop.f32.mrf.mxu1 }
 0x1ca   : > { %1390 = vst [vmem:[%s2616_s13 + $0xe0] sm:$0xff] %v1358_v19 }
 0x1cb   : > { %v1288_v24 = vadd.f32 %v1287_v11, %v1239_v12  ;;  %v1192_v27 = vadd.f32 %v1191_v8, %v1143_v15 }
 0x1cd   : > { %v1327_v29 = vadd.f32 %v2614_v48, %v1288_v24  ;;  %v1328_v10 = vadd.f32 %v2609_v38, %v1192_v27 }
 0x1cf   : > { %v1359_v30 = vmax.f32 %v1327_v29, 0.0  ;;  %v1360_v36 = vmax.f32 %v1328_v10, 0.0 }
 0x1d0   : > { %v1240_v20 = vpop.f32.mrf.mxu2 }
 0x1d1   : > { %1391 = vst [vmem:[%s2616_s13 + $0xe8] sm:$0xff] %v1359_v30  ;;  %v1241_v22 = vadd.f32 %v1240_v20, %v2606_v33  ;;  %v1289_v23 = vpop.f32.mrf.mxu3 }
 0x1d2   : > { %1392 = vst [vmem:[%s2616_s13 + $0xf0] sm:$0xff] %v1360_v36 }
 0x1d3   : > { %v1290_v37 = vadd.f32 %v1289_v23, %v1241_v22 }
 0x1d5   : > { %v1329_v38 = vadd.f32 %v2614_v48, %v1290_v37 }
 0x1d7   : > { %v1361_v44 = vmax.f32 %v1329_v38, 0.0 }
 0x1d9   : > { %1393 = vst [vmem:[%s2616_s13 + $0xf8] sm:$0xff] %v1361_v44 }
 0x1da   : > { %2253 = shalt.err (!%p2250_p0)
}
 0x1db   : > { %s2321_s2 = smov 256   ;;  %s2322_s28 = smov 16  }
 0x1dc   : > { %2062 = dma.vmem_to_hbm [thread:$0]  (%p2426_p5), %s1411_s8, 4096, %s1413_s18, %s1395_s25, %s2321_s2, %s2321_s2, %s2322_s28  }
 0x1dd PF: > { %s1427_s7 = sand.u32 1, %s2296_s15   ;;  %p2076_p3 = pnand %p1548_p11, %p2393_p6 }
 0x1de   : > { %s1428_s21 = scalar_lea.sflag [#allocation4], %s1427_s7 }
 0x1df   : > { %p2077_p7 = pneg %p2076_p3 }
 0x1e1   : > { %2291 = dma.done.wait (%p2077_p7), %s1428_s21, 4096  }
 0x1e2   : > { %2293 = vsyncadd (%p2077_p7), %s1428_s21, 4294963200  ;;  %s23_s20 = sadd.s32 1, %s2316_s20   ;;  %s2773_s23 = sld [smem:[#allocation15_spill]] }
 0x1e3   : > { %p20_p9 = scmp.ge.s32.totalorder %s23_s20, 4   ;;  %s2774_s18 = sld [smem:[#allocation13_spill]] }
 0x1e4   : > { %s2775_s19 = sld [smem:[#allocation14_spill]]  ;;  %s2776_s15 = smov %s2300_s16 }
 0x1e5   : > { %s2777_s16 = smov %s2304_s17  ;;  %22 = sbr.rel (!%p20_p9) target bundleno = 10 (0xa), region = 102 }
 0x1e8   : > { %s2778_s17 = smov %s2773_s23 }
 0x1ea   :  { %1434 = vsyncpa [#allocation3], 1 }
 0x1eb   :  { %1436 = vsyncpa [#allocation3 + $0x1], 1 }
 0x1ec   :  { %1437 = vsyncpa [#allocation6], 1 }
 0x1ed   :  { %1439 = vsyncpa [#allocation6 + $0x1], 1 }
 0x1ee   :  { %1440 = vsyncpa [#allocation4], 1 }
 0x1ef   :  { %1442 = vsyncpa [#allocation4 + $0x1], 1 }

</bundles_post_ra>
